<compile_context>
chip_gen: v6e
topology: v6e:2x2x1
jax: 0.10.0
libtpu: 0.0.40
codegen_flags: <defaults>
</compile_context>

<pallas_src>
import jax
import jax.numpy as jnp
import numpy as np
from jax.experimental import pallas as pl
from jax.experimental.pallas import tpu as pltpu


def _round_up(x, m):
    return (x + m - 1) // m * m


def _fusion_gate_kernel(b_ref, i_ref, wb_ref, wi_ref, bias_ref, o_ref):
    d = b_ref.shape[-1]
    bundle = b_ref[...]            # (TN, D)
    item = i_ref[...]              # (TN, D)

    # Fused linear1+linear2 over the folded concat:
    #   h = [h1 | h2] = bundle @ Wb + item @ Wi + [b1 | b2]        (TN, 2D)
    h = (jnp.dot(bundle, wb_ref[...], preferred_element_type=jnp.float32)
         + jnp.dot(item, wi_ref[...], preferred_element_type=jnp.float32)
         + bias_ref[...])
    h1 = h[:, :d]
    h2 = h[:, d:]

    # ELU (alpha=1.0).  Clamp the exp argument so the untaken branch never
    # produces inf (matches F.elu semantics).
    fusion = jnp.where(h1 > 0, h1, jnp.exp(jnp.minimum(h1, 0.0)) - 1.0)
    gate = jax.nn.sigmoid(h2)      # logistic -> EUP

    # out = gate*fusion + (1-gate)*bundle, rewritten with one fewer mul/sub.
    o_ref[...] = bundle + gate * (fusion - bundle)


def feature_fusion_gate(bundle_like, item_like, params, *, row_tile=512):
    """params: dict with w1 (2D, D), b1 (D,), w2 (2D, D), b2 (D,)."""
    n, d = bundle_like.shape
    w1, b1, w2, b2 = params["w1"], params["b1"], params["w2"], params["b2"]

    # One-time wrapper work: split the cat-weights and fuse the two linears
    # along the output-feature dim.
    wb = jnp.concatenate([w1[:d], w2[:d]], axis=1)        # (D, 2D) bundle half
    wi = jnp.concatenate([w1[d:], w2[d:]], axis=1)        # (D, 2D) item half
    bias = jnp.concatenate([b1, b2]).reshape(1, 2 * d)    # (1, 2D)

    # Row tile: as large as reasonable (pipeline efficiency), multiple of 8.
    tn = min(row_tile, _round_up(n, 8))
    n_pad = _round_up(n, tn)
    if n_pad != n:
        pad = ((0, n_pad - n), (0, 0))
        bundle_like = jnp.pad(bundle_like, pad)
        item_like = jnp.pad(item_like, pad)
    grid = (n_pad // tn,)

    # VMEM budget: resident fused weights/bias (x2 buffers) + double-buffered
    # bundle/item/out tiles.  Clamp into a sane range for all generations.
    # TODO(synk): for very large D (>= ~2048 f32) on v7x (64 MiB VMEM) the
    # resident weights alone overflow; would need bf16 weights or an extra
    # grid axis over output features.
    weight_bytes = 2 * (d * 2 * d) * 4 + (2 * d) * 4
    act_bytes = 3 * tn * d * 4
    vmem_limit = int(min(96 * 1024 * 1024,
                         max(32 * 1024 * 1024,
                             2 * weight_bytes + 2 * act_bytes + (4 << 20))))

    out = pl.pallas_call(
        _fusion_gate_kernel,
        out_shape=jax.ShapeDtypeStruct((n_pad, d), jnp.float32),
        grid_spec=pltpu.PrefetchScalarGridSpec(
            num_scalar_prefetch=0,
            grid=grid,
            in_specs=[
                pl.BlockSpec((tn, d), lambda i: (i, 0)),      # bundle tile (streamed)
                pl.BlockSpec((tn, d), lambda i: (i, 0)),      # item tile   (streamed)
                pl.BlockSpec((d, 2 * d), lambda i: (0, 0)),   # fused W bundle half (resident)
                pl.BlockSpec((d, 2 * d), lambda i: (0, 0)),   # fused W item half   (resident)
                pl.BlockSpec((1, 2 * d), lambda i: (0, 0)),   # fused bias          (resident)
            ],
            out_specs=pl.BlockSpec((tn, d), lambda i: (i, 0)),
        ),
        compiler_params=pltpu.CompilerParams(
            dimension_semantics=("parallel",),   # megacore sharding on v7x
            vmem_limit_bytes=vmem_limit,
        ),
    )(bundle_like, item_like, wb, wi, bias)

    return out[:n] if n_pad != n else out


def _reference(bundle_like, item_like, params):
    cat = jnp.concatenate([bundle_like, item_like], axis=1)
    h1 = cat @ params["w1"] + params["b1"]
    h2 = cat @ params["w2"] + params["b2"]
    fusion = jax.nn.elu(h1)
    gate = jax.nn.sigmoid(h2)
    return gate * fusion + (1.0 - gate) * bundle_like


if __name__ == "__main__":
    N, D = 8, 32  # batch, embedding_dim (small test shape)
    key = jax.random.PRNGKey(0)
    k1, k2, k3, k4, k5, k6 = jax.random.split(key, 6)

    # Deterministic parameter init (nn.Linear-like uniform scale).
    bound = 1.0 / np.sqrt(2 * D)
    params = {
        "w1": jax.random.uniform(k1, (2 * D, D), jnp.float32, -bound, bound),
        "b1": jax.random.uniform(k2, (D,), jnp.float32, -bound, bound),
        "w2": jax.random.uniform(k3, (2 * D, D), jnp.float32, -bound, bound),
        "b2": jax.random.uniform(k4, (D,), jnp.float32, -bound, bound),
    }

    bundle_like = jax.random.normal(k5, (N, D), jnp.float32)
    item_like = jax.random.normal(k6, (N, D), jnp.float32)

    out = feature_fusion_gate(bundle_like, item_like, params)
    out = jax.block_until_ready(out)
    ref = _reference(bundle_like, item_like, params)
    np.testing.assert_allclose(np.asarray(out), np.asarray(ref),
                               rtol=1e-5, atol=1e-5)

    # Exercise the multi-tile grid + row-padding path as well.
    kb, ki = jax.random.split(jax.random.PRNGKey(1))
    N2 = 1000
    bundle2 = jax.random.normal(kb, (N2, D), jnp.float32)
    item2 = jax.random.normal(ki, (N2, D), jnp.float32)
    out2 = jax.block_until_ready(
        feature_fusion_gate(bundle2, item2, params, row_tile=512))
    ref2 = _reference(bundle2, item2, params)
    np.testing.assert_allclose(np.asarray(out2), np.asarray(ref2),
                               rtol=1e-5, atol=1e-5)

    print("KERNEL_OK")
</pallas_src>

<mosaic_0001>
module attributes {stable_mosaic.version = 11 : i64} {
  func.func @_fusion_gate_kernel(%arg0: i32, %arg1: memref<8x32xf32, #tpu.memory_space<vmem>>, %arg2: memref<8x32xf32, #tpu.memory_space<vmem>>, %arg3: memref<32x64xf32, #tpu.memory_space<vmem>>, %arg4: memref<32x64xf32, #tpu.memory_space<vmem>>, %arg5: memref<1x64xf32, #tpu.memory_space<vmem>>, %arg6: memref<8x32xf32, #tpu.memory_space<vmem>>) attributes {dimension_semantics = [#tpu.dimension_semantics<parallel>], iteration_bounds = array<i64: 1>, scalar_prefetch = 0 : i64, scratch_operands = 0 : i64, tpu.core_type = #tpu.core_type<tc>, window_params = [{transform_indices = @transform_0, window_bounds = array<i64: 8, 32>}, {transform_indices = @transform_1, window_bounds = array<i64: 8, 32>}, {pipeline_mode = #tpu.pipeline_mode<synchronous>, transform_indices = @transform_2, window_bounds = array<i64: 32, 64>}, {pipeline_mode = #tpu.pipeline_mode<synchronous>, transform_indices = @transform_3, window_bounds = array<i64: 32, 64>}, {pipeline_mode = #tpu.pipeline_mode<synchronous>, transform_indices = @transform_4, window_bounds = array<i64: 1, 64>}, {transform_indices = @transform_5, window_bounds = array<i64: 8, 32>}]} {
    %c0 = arith.constant 0 : index
    %c0_0 = arith.constant 0 : index
    %0 = vector.load %arg1[%c0, %c0_0] : memref<8x32xf32, #tpu.memory_space<vmem>>, vector<8x32xf32>
    %c0_1 = arith.constant 0 : index
    %c0_2 = arith.constant 0 : index
    %1 = vector.load %arg2[%c0_1, %c0_2] : memref<8x32xf32, #tpu.memory_space<vmem>>, vector<8x32xf32>
    %c0_3 = arith.constant 0 : index
    %c0_4 = arith.constant 0 : index
    %2 = vector.load %arg3[%c0_3, %c0_4] : memref<32x64xf32, #tpu.memory_space<vmem>>, vector<32x64xf32>
    %cst = arith.constant dense<0.000000e+00> : vector<8x64xf32>
    %3 = tpu.matmul %0, %2, %cst {dimension_numbers = #tpu.dot_dimension_numbers<[1], [0], [0], [1], [0, 0, 1, 1], [], []>} : vector<8x32xf32>, vector<32x64xf32>, vector<8x64xf32> -> vector<8x64xf32>
    %c0_5 = arith.constant 0 : index
    %c0_6 = arith.constant 0 : index
    %4 = vector.load %arg4[%c0_5, %c0_6] : memref<32x64xf32, #tpu.memory_space<vmem>>, vector<32x64xf32>
    %cst_7 = arith.constant dense<0.000000e+00> : vector<8x64xf32>
    %5 = tpu.matmul %1, %4, %cst_7 {dimension_numbers = #tpu.dot_dimension_numbers<[1], [0], [0], [1], [0, 0, 1, 1], [], []>} : vector<8x32xf32>, vector<32x64xf32>, vector<8x64xf32> -> vector<8x64xf32>
    %6 = arith.addf %3, %5 : vector<8x64xf32>
    %c0_8 = arith.constant 0 : index
    %c0_9 = arith.constant 0 : index
    %7 = vector.load %arg5[%c0_8, %c0_9] : memref<1x64xf32, #tpu.memory_space<vmem>>, vector<1x64xf32>
    %8 = vector.broadcast %7 : vector<1x64xf32> to vector<8x64xf32>
    %9 = arith.addf %6, %8 : vector<8x64xf32>
    %10 = vector.extract_strided_slice %9 {offsets = [0, 0], sizes = [8, 32], strides = [1, 1]} : vector<8x64xf32> to vector<8x32xf32>
    %11 = vector.extract_strided_slice %9 {offsets = [0, 32], sizes = [8, 32], strides = [1, 1]} : vector<8x64xf32> to vector<8x32xf32>
    %cst_10 = arith.constant 0.000000e+00 : f32
    %12 = vector.broadcast %cst_10 : f32 to vector<8x32xf32>
    %13 = arith.cmpf ogt, %10, %12 : vector<8x32xf32>
    %cst_11 = arith.constant 0.000000e+00 : f32
    %14 = vector.broadcast %cst_11 : f32 to vector<8x32xf32>
    %15 = arith.minimumf %10, %14 : vector<8x32xf32>
    %16 = math.exp %15 : vector<8x32xf32>
    %cst_12 = arith.constant 1.000000e+00 : f32
    %17 = vector.broadcast %cst_12 : f32 to vector<8x32xf32>
    %18 = arith.subf %16, %17 : vector<8x32xf32>
    %19 = arith.select %13, %10, %18 : vector<8x32xi1>, vector<8x32xf32>
    %20 = arith.negf %11 : vector<8x32xf32>
    %21 = math.exp %20 : vector<8x32xf32>
    %cst_13 = arith.constant 1.000000e+00 : f32
    %22 = vector.broadcast %cst_13 : f32 to vector<8x32xf32>
    %23 = arith.addf %22, %21 : vector<8x32xf32>
    %24 = arith.divf %22, %23 : vector<8x32xf32>
    %25 = arith.subf %19, %0 : vector<8x32xf32>
    %26 = arith.mulf %24, %25 : vector<8x32xf32>
    %27 = arith.addf %0, %26 : vector<8x32xf32>
    %c0_14 = arith.constant 0 : index
    %c0_15 = arith.constant 0 : index
    %28 = vector.load %arg6[%c0_14, %c0_15] : memref<8x32xf32, #tpu.memory_space<vmem>>, vector<8x32xf32>
    tpu.vector_store %arg6[%c0_14, %c0_15], %27 {strides = array<i32>} : memref<8x32xf32, #tpu.memory_space<vmem>>, vector<8x32xf32>,
    return
  }
  func.func @transform_0(%arg0: i32) -> (i32, i32) {
    %c0_i32 = arith.constant 0 : i32
    %c0_i32_0 = arith.constant 0 : i32
    return %arg0, %c0_i32 : i32, i32
  }
  func.func @transform_1(%arg0: i32) -> (i32, i32) {
    %c0_i32 = arith.constant 0 : i32
    %c0_i32_0 = arith.constant 0 : i32
    return %arg0, %c0_i32 : i32, i32
  }
  func.func @transform_2(%arg0: i32) -> (i32, i32) {
    %c0_i32 = arith.constant 0 : i32
    %c0_i32_0 = arith.constant 0 : i32
    %c0_i32_1 = arith.constant 0 : i32
    return %c0_i32, %c0_i32_0 : i32, i32
  }
  func.func @transform_3(%arg0: i32) -> (i32, i32) {
    %c0_i32 = arith.constant 0 : i32
    %c0_i32_0 = arith.constant 0 : i32
    %c0_i32_1 = arith.constant 0 : i32
    return %c0_i32, %c0_i32_0 : i32, i32
  }
  func.func @transform_4(%arg0: i32) -> (i32, i32) {
    %c0_i32 = arith.constant 0 : i32
    %c0_i32_0 = arith.constant 0 : i32
    %c0_i32_1 = arith.constant 0 : i32
    return %c0_i32, %c0_i32_0 : i32, i32
  }
  func.func @transform_5(%arg0: i32) -> (i32, i32) {
    %c0_i32 = arith.constant 0 : i32
    %c0_i32_0 = arith.constant 0 : i32
    return %arg0, %c0_i32 : i32, i32
  }
}

</mosaic_0001>

<bundles_post_ra>
// kernel: tpu_custom_call.1
= control target key start
LH: loop header
LB: loop body
LE: loop exit
PB: predicated region body
PF: predicated region fallthrough
CT: control target
= control target key end

     0   :  { %10 = vsyncpa [#allocation3], 0  ;;  %s502_s0 = inlined_call_operand.hbm [shape: f32[8,32], index: 0, kind: input, shape index: {}]   ;;  %s503_s1 = inlined_call_operand.hbm [shape: f32[8,32], index: 1, kind: input, shape index: {}]   ;;  %s504_s2 = inlined_call_operand.hbm [shape: f32[32,64], index: 2, kind: input, shape index: {}]   ;;  %s505_s3 = inlined_call_operand.hbm [shape: f32[32,64], index: 3, kind: input, shape index: {}]   ;;  %s506_s4 = inlined_call_operand.vmem [shape: f32[1,64], index: 4, kind: input, shape index: {}]   ;;  %s507_s5 = inlined_call_operand.hbm [shape: f32[8,32], index: 5, kind: output, shape index: {}]  }
   0x1   :  { %11 = vsyncpa [#allocation6], 0 }
   0x2   :  { %12 = vsyncpa [#allocation9], 0 }
   0x3   :  { %13 = vsyncpa [#allocation4], 0  ;;  %s440_s18 = smov [#allocation5]   ;;  %s441_s20 = smov [#allocation2]  }
   0x4   :  { %s30_s19 = sshll.u32 %s440_s18, 4  ;;  %s20_s21 = sshll.u32 %s441_s20, 4  ;;  %s31_s19 = int_to_ptr.vmem [resolvable:$true] %s30_s19  ;;  %s21_s21 = int_to_ptr.vmem [resolvable:$true] %s20_s21 }
   0x5   :  { %s340_s22 = scalar_lea.vmem %s31_s19, 128  ;;  %p345_p1 = scmp.lt.s32.totalorder %s31_s19, %s31_s19 }
   0x6   :  { %p341_p0 = scmp.ne.s32.totalorder %s31_s19, %s340_s22  ;;  %p346_p2 = scmp.lt.s32.totalorder %s340_s22, %s340_s22 }
   0x8   :  { %p347_p3 = por %p346_p2, %p345_p1 }
   0xa   :  { %p348_p4 = pnand %p347_p3, %p341_p0 }
   0xc   :  { %351 = shalt.err (!%p348_p4)
}
   0xd   :  { %33 = dma.hbm_to_vmem [thread:$0]  %s503_s1, 128, %s31_s19, [#allocation6]  }
   0xe   :  { %s360_s25 = scalar_lea.vmem %s21_s21, 128  ;;  %p365_p6 = scmp.lt.s32.totalorder %s21_s21, %s21_s21 }
   0xf   :  { %p361_p5 = scmp.ne.s32.totalorder %s21_s21, %s360_s25  ;;  %p366_p7 = scmp.lt.s32.totalorder %s360_s25, %s360_s25 }
  0x11   :  { %p367_p8 = por %p366_p7, %p365_p6 }
  0x13   :  { %p368_p9 = pnand %p367_p8, %p361_p5 }
  0x15   :  { %371 = shalt.err (!%p368_p9)
}
  0x16   :  { %23 = dma.hbm_to_vmem [thread:$0]  %s502_s0, 128, %s21_s21, [#allocation3]  }
  0x17   :  { %s442_s28 = smov [#allocation7]  }
  0x18   :  { %s39_s29 = sshll.u32 %s442_s28, 4  ;;  %s40_s29 = int_to_ptr.vmem [resolvable:$true] %s39_s29 }
  0x19   :  { %s380_s30 = scalar_lea.vmem %s40_s29, 512  ;;  %p385_p11 = scmp.lt.s32.totalorder %s40_s29, %s40_s29 }
  0x1a   :  { %p381_p10 = scmp.ne.s32.totalorder %s40_s29, %s380_s30  ;;  %p386_p12 = scmp.lt.s32.totalorder %s380_s30, %s380_s30 }
  0x1c   :  { %p387_p13 = por %p386_p12, %p385_p11 }
  0x1e   :  { %p388_p0 = pnand %p387_p13, %p381_p10 }
  0x20   :  { %391 = shalt.err (!%p388_p0)
}
  0x21   :  { %s443_s1 = smov 128   ;;  %s444_s6 = smov 8  }
  0x22   :  { %45 = dma.hbm_to_vmem [thread:$0]  %s504_s2, 512, %s40_s29, [#allocation6], %s443_s1, %s443_s1, %s444_s6  }
  0x23   :  { %s445_s9 = smov [#allocation8]  }
  0x24   :  { %s51_s10 = sshll.u32 %s445_s9, 4  ;;  %s52_s10 = int_to_ptr.vmem [resolvable:$true] %s51_s10 }
  0x25   :  { %s400_s0 = scalar_lea.vmem %s52_s10, 512  ;;  %p405_p2 = scmp.lt.s32.totalorder %s52_s10, %s52_s10 }
  0x26   :  { %p401_p1 = scmp.ne.s32.totalorder %s52_s10, %s400_s0  ;;  %p406_p3 = scmp.lt.s32.totalorder %s400_s0, %s400_s0 }
  0x28   :  { %p407_p4 = por %p406_p3, %p405_p2 }
  0x2a   :  { %p408_p5 = pnand %p407_p4, %p401_p1 }
  0x2c   :  { %411 = shalt.err (!%p408_p5)
}
  0x2d   :  { %57 = dma.hbm_to_vmem [thread:$0]  %s505_s3, 512, %s52_s10, [#allocation9], %s443_s1, %s443_s1, %s444_s6  }
  0x2e   :  { %432 = dma.done.wait [#allocation3], 128  }
  0x2f   :  { %433 = vsyncadd [#allocation3], 4294967168 }
  0x30   :  { %434 = dma.done.wait [#allocation6], 640  }
  0x31   :  { %435 = vsyncadd [#allocation6], 4294966656 }
  0x32   :  { %436 = dma.done.wait [#allocation9], 512  }
  0x33   :  { %437 = vsyncadd [#allocation9], 4294966784  ;;  %v446_v0 = vmov 0.0   ;;  %vm447_vm0 = vmmov 0   ;;  %v81_v1 = vld [vmem:[#allocation8 + $0x18] sm:$0xff]  ;;  %v80_v3 = vld [vmem:[#allocation8 + $0x10] sm:$0xff] }
  0x34   :  { %293 = vmatprep.subr.mxu0 %v446_v0  ;;  %304 = vmatprep.subr.mxu1 %v446_v0  ;;  %v77_v2 = vld [vmem:[#allocation7 + $0x18] sm:$0xff]  ;;  %v76_v4 = vld [vmem:[#allocation7 + $0x10] sm:$0xff]  ;;  %v79_v5 = vld [vmem:[#allocation8 + $0x8] sm:$0xff]  ;;  %vm82_vm1 = vcmask 261120   ;;  %s448_s13 = smov 32   ;;  %s450_s14 = smov [#allocation10]  }
  0x35   :  { %301 = vmatprep.mubr.msk.f32.mxu0 %vm447_vm0, %v446_v0  ;;  %312 = vmatprep.mubr.msk.f32.mxu1 %vm447_vm0, %v446_v0  ;;  %v75_v6 = vld [vmem:[#allocation7 + $0x8] sm:$0xff]  ;;  %v78_v7 = vld [vmem:[#allocation8] sm:$0xff]  ;;  %v73_v9 = vld [vmem:[#allocation5] sm:$0xff]  ;;  %s267_s15 = sshll.u32 %s450_s14, 4  ;;  %s268_s15 = int_to_ptr.vmem [resolvable:$true] %s267_s15 }
  0x36   :  { %294 = vmatpush3.msra.mxu0 %v81_v1  ;;  %305 = vmatpush3.msra.mxu1 %v77_v2  ;;  %v74_v8 = vld [vmem:[#allocation7] sm:$0xff]  ;;  %v72_v10 = vld [vmem:[#allocation2] sm:$0xff]  ;;  %s412_s16 = scalar_lea.vmem %s268_s15, 128  ;;  %p417_p7 = scmp.lt.s32.totalorder %s268_s15, %s268_s15 }
  0x37   :  { %295 = vmatprep.subr.mxu0 %v446_v0  ;;  %306 = vmatprep.subr.mxu1 %v446_v0  ;;  %v280_v13 = vld [vmem:[%s506_s4] ss:$0 sm:$0xff]  ;;  %s449_s4 = smov 96   ;;  %p413_p6 = scmp.ne.s32.totalorder %s268_s15, %s412_s16 }
  0x38   :  { %296 = vmatpush3.msra.mxu0 %v80_v3  ;;  %307 = vmatpush3.msra.mxu1 %v76_v4  ;;  %p418_p8 = scmp.lt.s32.totalorder %s412_s16, %s412_s16 }
  0x39   :  { %297 = vmatprep.subr.mxu0 %v446_v0  ;;  %308 = vmatprep.subr.mxu1 %v446_v0 }
  0x3a   :  { %298 = vmatpush3.msra.mxu0 %v79_v5  ;;  %309 = vmatpush3.msra.mxu1 %v75_v6  ;;  %p419_p9 = por %p418_p8, %p417_p7 }
  0x3b   :  { %299 = vmatprep.subr.mxu0 %v446_v0  ;;  %310 = vmatprep.subr.mxu1 %v446_v0 }
  0x3c   :  { %300 = vmatpush3.msra.mxu0 %v78_v7  ;;  %311 = vmatpush3.msra.mxu1 %v74_v8  ;;  %p420_p10 = pnand %p419_p9, %p413_p6 }
  0x3d   :  { %302 = vmatmul.mubr.msk.f32.vlgmr.msra.gmra.mxu0 %vm82_vm1, %v73_v9  ;;  %313 = vmatmul.mubr.msk.f32.vlgmr.msra.gmra.mxu1 %vm82_vm1, %v72_v10 }
  0xfd   :  { %v152_v11 = vpop.f32.mrf.mxu0  ;;  %v225_v12 = vpop.f32.mrf.mxu1 }
  0xfe   :  { %v226_v14 = vadd.f32 %v225_v12, %v152_v11 }
  0xff   :  { %v303_v15 = vpop.f32.mrf.mxu0  ;;  %v314_v16 = vpop.f32.mrf.mxu1 }
 0x100   :  { %v236_v17 = vadd.f32 %v280_v13, %v226_v14 }
 0x102   :  { %v238_v18 = vmin.f32 %v236_v17, 0.0  ;;  %vm237_vm2 = vcmp.gt.f32.partialorder %v236_v17, 0.0  ;;  %v282_v24 = vmul.f32 -1.442695, %v236_v17 }
 0x104   :  { %v239_v19 = vmul.f32 1.442695, %v238_v18 }
 0x106   :  { %326 = vpow2.f32 %v239_v19 }
 0x107   :  { %328 = vpow2.f32 %v282_v24 }
 0x113   :  { %v327_v20 = vpop.eup %326 }
 0x114   :  { %v281_v21 = vadd.f32 -1.0, %v327_v20  ;;  %v329_v25 = vpop.eup %328 }
 0x115   :  { %v246_v26 = vadd.f32 1.0, %v329_v25 }
 0x116   :  { %v242_v22 = vsel %vm237_vm2, %v236_v17, %v281_v21 }
 0x117   :  { %v249_v23 = vsub.f32 %v242_v22, %v72_v10  ;;  %330 = vrcp.f32 %v246_v26 }
 0x119   :  { %251 = vrot.lane.b32.xlu0 %v249_v23, %s448_s13 }
 0x124   :  { %v331_v27 = vpop.eup %330 }
 0x18b   :  { %v252_v28 = vpop.permute.xlu0 %251 }
 0x18c   :  { %v254_v29 = vmul.f32 %v331_v27, %v252_v28 }
 0x18e   :  { %256 = vrot.lane.b32.xlu0 %v254_v29, %s449_s4 }
 0x200   :  { %v257_v30 = vpop.permute.xlu0 %256 }
 0x201   :  { %v259_v31 = vadd.f32 %v257_v30, %v72_v10 }
 0x203   :  { %260 = vst.msk [vmem:[#allocation10] sm:$0xff] %vm82_vm1, %v259_v31 }
 0x204   :  { %423 = shalt.err (!%p420_p10)
}
 0x205   :  { %270 = dma.vmem_to_hbm [thread:$0]  %s268_s15, 128, %s507_s5, [#allocation4]  }
 0x206   :  { %438 = dma.done.wait [#allocation4], 128  }
 0x207   :  { %439 = vsyncadd [#allocation4], 4294967168 }
 0x208   :  { %274 = vsyncpa [#allocation3], 1 }
 0x209   :  { %275 = vsyncpa [#allocation6], 1 }
 0x20a   :  { %276 = vsyncpa [#allocation9], 1 }
 0x20b   :  { %277 = vsyncpa [#allocation4], 1 }

</bundles_post_ra>
